<compile_context>
chip_gen: v5e
topology: v5e:2x2
jax: 0.10.0
libtpu: 0.0.40
codegen_flags: <defaults>
</compile_context>

<pallas_src>
import jax
import jax.numpy as jnp
from jax.experimental import pallas as pl
from jax.experimental.pallas import tpu as pltpu


def _round_up(x, m):
    return ((x + m - 1) // m) * m


def _mlp_kernel(x_ref, w1_ref, b1_ref, w2_ref, b2_ref, o_ref):
    # Layer 1 on the MXU: cast the f32 x tile to bf16 in-register (no extra
    # HBM traffic) and accumulate in f32.
    x_bf16 = x_ref[...].astype(jnp.bfloat16)
    h = jnp.dot(x_bf16, w1_ref[...], preferred_element_type=jnp.float32)
    # Bias + ReLU on the VPU in f32.
    h = jnp.maximum(h + b1_ref[...], 0.0)
    # Layer 2 (hidden -> 1): VPU multiply + XLU lane reduction against the
    # (1, H) w2 row -- avoids a second MXU pass with N=1.  b2 is an SMEM
    # scalar.  Result is the natural (tb, 1) column; out-of-range batch rows
    # of the last tile are masked by Pallas on writeback.
    out = jnp.sum(h * w2_ref[...], axis=-1, keepdims=True) + b2_ref[0]
    o_ref[...] = out.astype(o_ref.dtype)


def _choose_batch_tiling(batch, batch_tile):
    """Near-even, sublane-aligned batch tiles; >=2 tiles for larger batches
    so the 'parallel' grid axis can use both TensorCores on v7x."""
    nb = max(1, pl.cdiv(batch, batch_tile))
    if batch >= 256:
        nb = max(nb, 2)
    tb = _round_up(pl.cdiv(batch, nb), 8)
    nb = pl.cdiv(batch, tb)
    return tb, nb


def baseline_mlp_forward(x, w1, b1, w2, b2, *, batch_tile=1024):
    """x: (B, C, H, W) float32. w1: (D, H), b1: (H,), w2: (H, 1), b2: (1,).

    Returns (B, 1) float32, equal to ReLU(x_flat @ w1 + b1) @ w2 + b2 with the
    first matmul performed with bf16 operands / f32 accumulation.
    """
    batch = x.shape[0]
    x_flat = x.reshape(batch, -1)                 # row-major == torch .view
    d = x_flat.shape[1]
    hidden = w1.shape[1]

    tb, nb = _choose_batch_tiling(batch, batch_tile)

    # Weight prep is casts/reshapes only (no HBM-side padding).  In a real
    # serving/training loop, hoist these out of the per-call path (pre-store
    # w1 in bf16).
    w1_bf16 = w1.astype(jnp.bfloat16)                       # (D, H)
    b1_row = b1.astype(jnp.float32).reshape(1, hidden)      # (1, H)
    w2_row = w2.astype(jnp.float32).reshape(1, hidden)      # (1, H)
    b2_s = b2.astype(jnp.float32).reshape(1)                # SMEM scalar

    cost = pl.CostEstimate(
        flops=2 * batch * d * hidden + 4 * batch * hidden,
        transcendentals=0,
        bytes_accessed=batch * d * 4 + d * hidden * 2 + 2 * hidden * 4
        + batch * 4 + 4,
    )

    # TODO(synk): if input_dim grows to >= ~8-16K, add a K grid axis
    # ("arbitrary", last) with a VMEM f32 accumulator so w1 / x are K-tiled
    # instead of holding the full reduction width in VMEM (matters on v7x's
    # 64 MiB VMEM).
    out = pl.pallas_call(
        _mlp_kernel,
        out_shape=jax.ShapeDtypeStruct((batch, 1), jnp.float32),
        grid=(nb,),
        in_specs=[
            pl.BlockSpec((tb, d), lambda i: (i, 0)),          # x tile, pipelined
            pl.BlockSpec((d, hidden), lambda i: (0, 0)),      # w1 resident (bf16)
            pl.BlockSpec((1, hidden), lambda i: (0, 0)),      # b1 resident
            pl.BlockSpec((1, hidden), lambda i: (0, 0)),      # w2 row resident
            pl.BlockSpec(memory_space=pltpu.MemorySpace.SMEM),  # b2 scalar
        ],
        out_specs=pl.BlockSpec((tb, 1), lambda i: (i, 0)),
        compiler_params=pltpu.CompilerParams(
            dimension_semantics=("parallel",),
        ),
        cost_estimate=cost,
    )(x_flat, w1_bf16, b1_row, w2_row, b2_s)

    return out


def init_params(key, input_dim, hidden_dim):
    """Deterministic init mirroring nn.Linear shapes (stored transposed)."""
    k1, k2, k3, k4 = jax.random.split(key, 4)
    bound1 = 1.0 / jnp.sqrt(input_dim)
    bound2 = 1.0 / jnp.sqrt(hidden_dim)
    w1 = jax.random.uniform(k1, (input_dim, hidden_dim), jnp.float32, -bound1, bound1)
    b1 = jax.random.uniform(k2, (hidden_dim,), jnp.float32, -bound1, bound1)
    w2 = jax.random.uniform(k3, (hidden_dim, 1), jnp.float32, -bound2, bound2)
    b2 = jax.random.uniform(k4, (1,), jnp.float32, -bound2, bound2)
    return w1, b1, w2, b2


if __name__ == "__main__":
    # Small shapes consistent with the module: 4-channel 16x16 input,
    # input_dim = 4*16*16 = 1024, hidden_dim = 32, batch = 2.
    B, C, H, W = 2, 4, 16, 16
    input_dim = C * H * W
    hidden_dim = 32

    key = jax.random.PRNGKey(0)
    kx, kp = jax.random.split(key)
    x = jax.random.normal(kx, (B, C, H, W), dtype=jnp.float32)
    w1, b1, w2, b2 = init_params(kp, input_dim, hidden_dim)

    out = baseline_mlp_forward(x, w1, b1, w2, b2)
    out = jax.block_until_ready(out)
    assert out.shape == (B, 1)

    x_flat = x.reshape(B, -1)
    # Reference matching the kernel's bf16-operand / f32-accumulate layer 1.
    h_bf16 = jnp.maximum(
        jnp.dot(x_flat.astype(jnp.bfloat16), w1.astype(jnp.bfloat16),
                preferred_element_type=jnp.float32) + b1, 0.0)
    ref_bf16 = h_bf16 @ w2 + b2
    # Full f32 reference for the module semantics (loose tolerance for bf16).
    ref_f32 = jnp.maximum(x_flat @ w1 + b1, 0.0) @ w2 + b2

    assert jnp.allclose(out, ref_bf16, atol=2e-3, rtol=2e-3)
    assert jnp.allclose(out, ref_f32, atol=5e-2, rtol=5e-2)

    print("KERNEL_OK")
</pallas_src>

<mosaic_0001>
module attributes {stable_mosaic.version = 11 : i64} {
  func.func @_mlp_kernel(%arg0: i32, %arg1: memref<8x1024xf32, #tpu.memory_space<vmem>>, %arg2: memref<1024x32xbf16, #tpu.memory_space<vmem>>, %arg3: memref<1x32xf32, #tpu.memory_space<vmem>>, %arg4: memref<1x32xf32, #tpu.memory_space<vmem>>, %arg5: memref<1xf32, #tpu.memory_space<smem>>, %arg6: memref<8x1xf32, #tpu.memory_space<vmem>>) attributes {dimension_semantics = [#tpu.dimension_semantics<parallel>], iteration_bounds = array<i64: 1>, scalar_prefetch = 0 : i64, scratch_operands = 0 : i64, tpu.core_type = #tpu.core_type<tc>, window_params = [{transform_indices = @transform_0, window_bounds = array<i64: 8, 1024>}, {pipeline_mode = #tpu.pipeline_mode<synchronous>, transform_indices = @transform_1, window_bounds = array<i64: 1024, 32>}, {pipeline_mode = #tpu.pipeline_mode<synchronous>, transform_indices = @transform_2, window_bounds = array<i64: 1, 32>}, {pipeline_mode = #tpu.pipeline_mode<synchronous>, transform_indices = @transform_3, window_bounds = array<i64: 1, 32>}, {transform_indices = @transform_4, window_bounds = array<i64: 1>}, {transform_indices = @transform_5, window_bounds = array<i64: 8, 1>}]} {
    %c0 = arith.constant 0 : index
    %c0_0 = arith.constant 0 : index
    %0 = vector.load %arg1[%c0, %c0_0] : memref<8x1024xf32, #tpu.memory_space<vmem>>, vector<8x1024xf32>
    %1 = arith.truncf %0 : vector<8x1024xf32> to vector<8x1024xbf16>
    %c0_1 = arith.constant 0 : index
    %c0_2 = arith.constant 0 : index
    %2 = vector.load %arg2[%c0_1, %c0_2] : memref<1024x32xbf16, #tpu.memory_space<vmem>>, vector<1024x32xbf16>
    %cst = arith.constant dense<0.000000e+00> : vector<8x32xf32>
    %3 = tpu.matmul %1, %2, %cst {dimension_numbers = #tpu.dot_dimension_numbers<[1], [0], [0], [1], [0, 0, 1, 1], [], []>} : vector<8x1024xbf16>, vector<1024x32xbf16>, vector<8x32xf32> -> vector<8x32xf32>
    %c0_3 = arith.constant 0 : index
    %c0_4 = arith.constant 0 : index
    %4 = vector.load %arg3[%c0_3, %c0_4] : memref<1x32xf32, #tpu.memory_space<vmem>>, vector<1x32xf32>
    %5 = vector.broadcast %4 : vector<1x32xf32> to vector<8x32xf32>
    %6 = arith.addf %3, %5 : vector<8x32xf32>
    %cst_5 = arith.constant 0.000000e+00 : f32
    %7 = vector.broadcast %cst_5 : f32 to vector<8x32xf32>
    %8 = arith.maximumf %6, %7 : vector<8x32xf32>
    %c0_6 = arith.constant 0 : index
    %c0_7 = arith.constant 0 : index
    %9 = vector.load %arg4[%c0_6, %c0_7] : memref<1x32xf32, #tpu.memory_space<vmem>>, vector<1x32xf32>
    %10 = vector.broadcast %9 : vector<1x32xf32> to vector<8x32xf32>
    %11 = arith.mulf %8, %10 : vector<8x32xf32>
    %cst_8 = arith.constant dense<0.000000e+00> : vector<8xf32>
    %12 = vector.multi_reduction <add>, %11, %cst_8 [1] : vector<8x32xf32> to vector<8xf32>
    %13 = vector.shape_cast %12 : vector<8xf32> to vector<8x1xf32>
    %c0_9 = arith.constant 0 : index
    %14 = memref.load %arg5[%c0_9] : memref<1xf32, #tpu.memory_space<smem>>
    %15 = vector.broadcast %14 : f32 to vector<8x1xf32>
    %16 = arith.addf %13, %15 : vector<8x1xf32>
    %c0_10 = arith.constant 0 : index
    %c0_11 = arith.constant 0 : index
    %17 = vector.load %arg6[%c0_10, %c0_11] : memref<8x1xf32, #tpu.memory_space<vmem>>, vector<8x1xf32>
    tpu.vector_store %arg6[%c0_10, %c0_11], %16 {strides = array<i32>} : memref<8x1xf32, #tpu.memory_space<vmem>>, vector<8x1xf32>,
    return
  }
  func.func @transform_0(%arg0: i32) -> (i32, i32) {
    %c0_i32 = arith.constant 0 : i32
    %c0_i32_0 = arith.constant 0 : i32
    return %arg0, %c0_i32 : i32, i32
  }
  func.func @transform_1(%arg0: i32) -> (i32, i32) {
    %c0_i32 = arith.constant 0 : i32
    %c0_i32_0 = arith.constant 0 : i32
    %c0_i32_1 = arith.constant 0 : i32
    return %c0_i32, %c0_i32_0 : i32, i32
  }
  func.func @transform_2(%arg0: i32) -> (i32, i32) {
    %c0_i32 = arith.constant 0 : i32
    %c0_i32_0 = arith.constant 0 : i32
    %c0_i32_1 = arith.constant 0 : i32
    return %c0_i32, %c0_i32_0 : i32, i32
  }
  func.func @transform_3(%arg0: i32) -> (i32, i32) {
    %c0_i32 = arith.constant 0 : i32
    %c0_i32_0 = arith.constant 0 : i32
    %c0_i32_1 = arith.constant 0 : i32
    return %c0_i32, %c0_i32_0 : i32, i32
  }
  func.func @transform_4(%arg0: i32) -> i32 {
    %c0_i32 = arith.constant 0 : i32
    %c0_i32_0 = arith.constant 0 : i32
    return %c0_i32 : i32
  }
  func.func @transform_5(%arg0: i32) -> (i32, i32) {
    %c0_i32 = arith.constant 0 : i32
    %c0_i32_0 = arith.constant 0 : i32
    return %arg0, %c0_i32 : i32, i32
  }
}

</mosaic_0001>

<bundles_post_ra>
// kernel: tpu_custom_call.1
= control target key start
LH: loop header
LB: loop body
LE: loop exit
PB: predicated region body
PF: predicated region fallthrough
CT: control target
= control target key end

     0   :  { %vm702_vm0 = vcmask 261120   ;;  %vm709_vm1 = vcmask 7168   ;;  %s1332_s0 = inlined_call_operand.vmem [shape: f32[2,1024], index: 0, kind: input, shape index: {}]   ;;  %s1333_s1 = inlined_call_operand.vmem [shape: bf16[1024,32], index: 1, kind: input, shape index: {}]   ;;  %s1334_s2 = inlined_call_operand.vmem [shape: f32[1,32], index: 2, kind: input, shape index: {}]   ;;  %s1335_s3 = inlined_call_operand.vmem [shape: f32[1,32], index: 3, kind: input, shape index: {}]   ;;  %s1336_s4 = inlined_call_operand.<no memory space> [shape: f32[1], index: 4, kind: input, shape index: {}]   ;;  %s1337_s5 = inlined_call_operand.vmem [shape: f32[2,1], index: 5, kind: output, shape index: {}]  }
   0x1   :  { %v1015_v0 = vld [vmem:[%s1333_s1 + $0x38] sm:$0xff]  ;;  %v1014_v4 = vld [vmem:[%s1333_s1 + $0x30] sm:$0xff]  ;;  %v1013_v8 = vld [vmem:[%s1333_s1 + $0x28] sm:$0xff] }
   0x2   :  { %v1023_v1 = vld [vmem:[%s1333_s1 + $0x78] sm:$0xff]  ;;  %592 = vmatpush.bf16.msra.mxu0 %v1015_v0  ;;  %v1022_v5 = vld [vmem:[%s1333_s1 + $0x70] sm:$0xff]  ;;  %v1021_v9 = vld [vmem:[%s1333_s1 + $0x68] sm:$0xff] }
   0x3   :  { %v1031_v2 = vld [vmem:[%s1333_s1 + $0xb8] sm:$0xff]  ;;  %605 = vmatpush.bf16.msra.mxu1 %v1023_v1  ;;  %v1030_v6 = vld [vmem:[%s1333_s1 + $0xb0] sm:$0xff]  ;;  %v1029_v10 = vld [vmem:[%s1333_s1 + $0xa8] sm:$0xff] }
   0x4   :  { %v1039_v3 = vld [vmem:[%s1333_s1 + $0xf8] sm:$0xff]  ;;  %618 = vmatpush.bf16.msra.mxu2 %v1031_v2  ;;  %v1038_v7 = vld [vmem:[%s1333_s1 + $0xf0] sm:$0xff]  ;;  %v1037_v11 = vld [vmem:[%s1333_s1 + $0xe8] sm:$0xff] }
   0x5   :  { %631 = vmatpush.bf16.msra.mxu3 %v1039_v3  ;;  %v1012_v12 = vld [vmem:[%s1333_s1 + $0x20] sm:$0xff]  ;;  %v1011_v16 = vld [vmem:[%s1333_s1 + $0x18] sm:$0xff]  ;;  %v23_v18 = vld [vmem:[%s1332_s0 + $0x10] sm:$0xff] }
   0x6   :  { %593 = vmatpush.bf16.msra.mxu0 %v1014_v4  ;;  %v1020_v13 = vld [vmem:[%s1333_s1 + $0x60] sm:$0xff]  ;;  %v1019_v19 = vld [vmem:[%s1333_s1 + $0x58] sm:$0xff]  ;;  %v27_v21 = vld [vmem:[%s1332_s0 + $0x30] sm:$0xff]  ;;  %39 = vst [vmem:[#allocation1 + $0x1] ss:$4 sm:$0xff] %v23_v18 }
   0x7   :  { %606 = vmatpush.bf16.msra.mxu1 %v1022_v5  ;;  %v1028_v14 = vld [vmem:[%s1333_s1 + $0xa0] sm:$0xff]  ;;  %v1027_v22 = vld [vmem:[%s1333_s1 + $0x98] sm:$0xff]  ;;  %43 = vst [vmem:[#allocation1 + $0x3] ss:$4 sm:$0xff] %v27_v21  ;;  %v1010_v24 = vld [vmem:[%s1333_s1 + $0x10] sm:$0xff] }
   0x8   :  { %619 = vmatpush.bf16.msra.mxu2 %v1030_v6  ;;  %v1036_v15 = vld [vmem:[%s1333_s1 + $0xe0] sm:$0xff]  ;;  %v1035_v23 = vld [vmem:[%s1333_s1 + $0xd8] sm:$0xff]  ;;  %v1018_v25 = vld [vmem:[%s1333_s1 + $0x50] sm:$0xff] }
   0x9   :  { %632 = vmatpush.bf16.msra.mxu3 %v1038_v7  ;;  %v21_v17 = vld [vmem:[%s1332_s0] sm:$0xff]  ;;  %v1026_v26 = vld [vmem:[%s1333_s1 + $0x90] sm:$0xff]  ;;  %v22_v28 = vld [vmem:[%s1332_s0 + $0x8] sm:$0xff] }
   0xa   :  { %594 = vmatpush.bf16.msra.mxu0 %v1013_v8  ;;  %v25_v20 = vld [vmem:[%s1332_s0 + $0x20] sm:$0xff]  ;;  %37 = vst [vmem:[#allocation1] ss:$4 sm:$0xff] %v21_v17  ;;  %v1034_v27 = vld [vmem:[%s1333_s1 + $0xd0] sm:$0xff]  ;;  %v24_v29 = vld [vmem:[%s1332_s0 + $0x18] sm:$0xff] }
   0xb   :  { %607 = vmatpush.bf16.msra.mxu1 %v1021_v9  ;;  %41 = vst [vmem:[#allocation1 + $0x2] ss:$4 sm:$0xff] %v25_v20  ;;  %v1009_v30 = vld [vmem:[%s1333_s1 + $0x8] sm:$0xff]  ;;  %v1008_v35 = vld [vmem:[%s1333_s1] sm:$0xff]  ;;  %v28_v36 = vld [vmem:[%s1332_s0 + $0x38] sm:$0xff] }
   0xc   :  { %620 = vmatpush.bf16.msra.mxu2 %v1029_v10  ;;  %v1017_v31 = vld [vmem:[%s1333_s1 + $0x48] sm:$0xff]  ;;  %45 = vst [vmem:[#allocation1 + $0x20] ss:$4 sm:$0xff] %v22_v28  ;;  %v1016_v37 = vld [vmem:[%s1333_s1 + $0x40] sm:$0xff]  ;;  %v1047_v40 = vld [vmem:[%s1333_s1 + $0x138] sm:$0xff] }
   0xd   :  { %633 = vmatpush.bf16.msra.mxu3 %v1037_v11  ;;  %v1025_v32 = vld [vmem:[%s1333_s1 + $0x88] sm:$0xff]  ;;  %47 = vst [vmem:[#allocation1 + $0x21] ss:$4 sm:$0xff] %v24_v29  ;;  %v1024_v38 = vld [vmem:[%s1333_s1 + $0x80] sm:$0xff]  ;;  %v1055_v42 = vld [vmem:[%s1333_s1 + $0x178] sm:$0xff] }
   0xe   :  { %595 = vmatpush.bf16.msra.mxu0 %v1012_v12  ;;  %v1033_v33 = vld [vmem:[%s1333_s1 + $0xc8] sm:$0xff]  ;;  %v1032_v39 = vld [vmem:[%s1333_s1 + $0xc0] sm:$0xff]  ;;  %51 = vst [vmem:[#allocation1 + $0x23] ss:$4 sm:$0xff] %v28_v36  ;;  %v1063_v46 = vld [vmem:[%s1333_s1 + $0x1b8] sm:$0xff] }
   0xf   :  { %608 = vmatpush.bf16.msra.mxu1 %v1020_v13  ;;  %v26_v34 = vld [vmem:[%s1332_s0 + $0x28] sm:$0xff]  ;;  %v1071_v47 = vld [vmem:[%s1333_s1 + $0x1f8] sm:$0xff]  ;;  %v1046_v52 = vld [vmem:[%s1333_s1 + $0x130] sm:$0xff] }
  0x10   :  { %621 = vmatpush.bf16.msra.mxu2 %v1028_v14  ;;  %49 = vst [vmem:[#allocation1 + $0x22] ss:$4 sm:$0xff] %v26_v34  ;;  %v1054_v53 = vld [vmem:[%s1333_s1 + $0x170] sm:$0xff]  ;;  %v1045_v56 = vld [vmem:[%s1333_s1 + $0x128] sm:$0xff]  ;;  %v1044_v60 = vld [vmem:[%s1333_s1 + $0x120] sm:$0xff] }
  0x11   :  { %634 = vmatpush.bf16.msra.mxu3 %v1036_v15  ;;  %v1062_v54 = vld [vmem:[%s1333_s1 + $0x1b0] sm:$0xff]  ;;  %v1053_v57 = vld [vmem:[%s1333_s1 + $0x168] sm:$0xff]  ;;  %v1052_v61 = vld [vmem:[%s1333_s1 + $0x160] sm:$0xff] }
  0x12   :  { %596 = vmatpush.bf16.msra.mxu0 %v1011_v16  ;;  %v54_v41 = vld.sshfl [vmem:[#allocation1 + $0x10] sm:$0xff pattern:$0x73625140]  ;;  %v52_v43 = vld.sshfl [vmem:[#allocation1] sm:$0xff pattern:$0x73625140] }
  0x13   :  { %609 = vmatpush.bf16.msra.mxu1 %v1019_v19  ;;  %v55_v44 = vld.sshfl [vmem:[#allocation1 + $0x18] sm:$0xff pattern:$0x73625140]  ;;  %v53_v45 = vld.sshfl [vmem:[#allocation1 + $0x8] sm:$0xff pattern:$0x73625140]  ;;  %v70_v48 = vpack.c.bf16 %v54_v41, %v54_v41  ;;  %v68_v49 = vpack.c.bf16 %v52_v43, %v52_v43 }
  0x14   :  { %622 = vmatpush.bf16.msra.mxu2 %v1027_v22  ;;  %v71_v50 = vpack.c.bf16 %v55_v44, %v55_v44  ;;  %v69_v51 = vpack.c.bf16 %v53_v45, %v53_v45  ;;  %v1070_v55 = vld [vmem:[%s1333_s1 + $0x1f0] sm:$0xff]  ;;  %v1061_v58 = vld [vmem:[%s1333_s1 + $0x1a8] sm:$0xff]  ;;  %v1060_v62 = vld [vmem:[%s1333_s1 + $0x1a0] sm:$0xff] }
  0x15   :  { %635 = vmatpush.bf16.msra.mxu3 %v1035_v23  ;;  %v1069_v59 = vld [vmem:[%s1333_s1 + $0x1e8] sm:$0xff]  ;;  %v1068_v63 = vld [vmem:[%s1333_s1 + $0x1e0] sm:$0xff]  ;;  %v1043_v0 = vld [vmem:[%s1333_s1 + $0x118] sm:$0xff] }
  0x16   :  { %597 = vmatpush.bf16.msra.mxu0 %v1010_v24  ;;  %v1051_v1 = vld [vmem:[%s1333_s1 + $0x158] sm:$0xff]  ;;  %v1042_v4 = vld [vmem:[%s1333_s1 + $0x110] sm:$0xff]  ;;  %v1041_v8 = vld [vmem:[%s1333_s1 + $0x108] sm:$0xff] }
  0x17   :  { %610 = vmatpush.bf16.msra.mxu1 %v1018_v25  ;;  %v1059_v2 = vld [vmem:[%s1333_s1 + $0x198] sm:$0xff]  ;;  %v1050_v5 = vld [vmem:[%s1333_s1 + $0x150] sm:$0xff]  ;;  %v1049_v9 = vld [vmem:[%s1333_s1 + $0x148] sm:$0xff] }
  0x18   :  { %623 = vmatpush.bf16.msra.mxu2 %v1026_v26  ;;  %v1067_v3 = vld [vmem:[%s1333_s1 + $0x1d8] sm:$0xff]  ;;  %v1058_v6 = vld [vmem:[%s1333_s1 + $0x190] sm:$0xff]  ;;  %v1057_v10 = vld [vmem:[%s1333_s1 + $0x188] sm:$0xff] }
  0x19   :  { %636 = vmatpush.bf16.msra.mxu3 %v1034_v27  ;;  %v1066_v7 = vld [vmem:[%s1333_s1 + $0x1d0] sm:$0xff]  ;;  %v1065_v11 = vld [vmem:[%s1333_s1 + $0x1c8] sm:$0xff]  ;;  %v1040_v12 = vld [vmem:[%s1333_s1 + $0x100] sm:$0xff] }
  0x1a   :  { %598 = vmatpush.bf16.msra.mxu0 %v1009_v30  ;;  %v1048_v13 = vld [vmem:[%s1333_s1 + $0x140] sm:$0xff]  ;;  %v57_v17 = vld.sshfl [vmem:[#allocation1 + $0x28] sm:$0xff pattern:$0x73625140] }
  0x1b   :  { %611 = vmatpush.bf16.msra.mxu1 %v1017_v31  ;;  %v1056_v14 = vld [vmem:[%s1333_s1 + $0x180] sm:$0xff]  ;;  %v58_v18 = vld.sshfl [vmem:[#allocation1 + $0x30] sm:$0xff pattern:$0x73625140]  ;;  %v73_v21 = vpack.c.bf16 %v57_v17, %v57_v17 }
  0x1c   :  { %624 = vmatpush.bf16.msra.mxu2 %v1025_v32  ;;  %v1064_v15 = vld [vmem:[%s1333_s1 + $0x1c0] sm:$0xff]  ;;  %v59_v19 = vld.sshfl [vmem:[#allocation1 + $0x38] sm:$0xff pattern:$0x73625140]  ;;  %v74_v22 = vpack.c.bf16 %v58_v18, %v58_v18 }
  0x1d   :  { %637 = vmatpush.bf16.msra.mxu3 %v1033_v33  ;;  %v56_v16 = vld.sshfl [vmem:[#allocation1 + $0x20] sm:$0xff pattern:$0x73625140]  ;;  %v75_v23 = vpack.c.bf16 %v59_v19, %v59_v19 }
  0x1e   :  { %599 = vmatpush.bf16.msra.mxu0 %v1008_v35  ;;  %v72_v20 = vpack.c.bf16 %v56_v16, %v56_v16  ;;  %v1072_v30 = vld [vmem:[%s1334_s2] ss:$0 sm:$0xff] }
  0x1f   :  { %612 = vmatpush.bf16.msra.mxu1 %v1016_v37 }
  0x20   :  { %625 = vmatpush.bf16.msra.mxu2 %v1024_v38 }
  0x21   :  { %638 = vmatpush.bf16.msra.mxu3 %v1032_v39  ;;  %600 = vmatmul.bf16.vlgmr.msra.gmra.mxu0 %v68_v49 }
  0x22   :  { %644 = vmatpush.bf16.msrb.mxu0 %v1047_v40  ;;  %613 = vmatmul.bf16.vlgmr.msra.gmra.mxu1 %v69_v51 }
  0x23   :  { %657 = vmatpush.bf16.msrb.mxu1 %v1055_v42  ;;  %626 = vmatmul.bf16.vlgmr.msra.gmra.mxu2 %v70_v48 }
  0x24   :  { %670 = vmatpush.bf16.msrb.mxu2 %v1063_v46  ;;  %639 = vmatmul.bf16.vlgmr.msra.gmra.mxu3 %v71_v50 }
  0x25   :  { %683 = vmatpush.bf16.msrb.mxu3 %v1071_v47  ;;  %v1073_v47 = vld [vmem:[%s1335_s3] ss:$0 sm:$0xff] }
  0x26   :  { %645 = vmatpush.bf16.msrb.mxu0 %v1046_v52 }
  0x27   :  { %658 = vmatpush.bf16.msrb.mxu1 %v1054_v53  ;;  %v707_v53 = vstv %s1336_s4 }
  0x28   :  { %671 = vmatpush.bf16.msrb.mxu2 %v1062_v54 }
  0x29   :  { %684 = vmatpush.bf16.msrb.mxu3 %v1070_v55 }
  0x2a   :  { %646 = vmatpush.bf16.msrb.mxu0 %v1045_v56 }
  0x2b   :  { %659 = vmatpush.bf16.msrb.mxu1 %v1053_v57 }
  0x2c   :  { %672 = vmatpush.bf16.msrb.mxu2 %v1061_v58 }
  0x2d   :  { %685 = vmatpush.bf16.msrb.mxu3 %v1069_v59 }
  0x2e   :  { %647 = vmatpush.bf16.msrb.mxu0 %v1044_v60 }
  0x2f   :  { %660 = vmatpush.bf16.msrb.mxu1 %v1052_v61 }
  0x30   :  { %673 = vmatpush.bf16.msrb.mxu2 %v1060_v62 }
  0x31   :  { %686 = vmatpush.bf16.msrb.mxu3 %v1068_v63 }
  0x32   :  { %648 = vmatpush.bf16.msrb.mxu0 %v1043_v0 }
  0x33   :  { %661 = vmatpush.bf16.msrb.mxu1 %v1051_v1 }
  0x34   :  { %674 = vmatpush.bf16.msrb.mxu2 %v1059_v2 }
  0x35   :  { %687 = vmatpush.bf16.msrb.mxu3 %v1067_v3 }
  0x36   :  { %649 = vmatpush.bf16.msrb.mxu0 %v1042_v4 }
  0x37   :  { %662 = vmatpush.bf16.msrb.mxu1 %v1050_v5 }
  0x38   :  { %675 = vmatpush.bf16.msrb.mxu2 %v1058_v6 }
  0x39   :  { %688 = vmatpush.bf16.msrb.mxu3 %v1066_v7 }
  0x3a   :  { %650 = vmatpush.bf16.msrb.mxu0 %v1041_v8 }
  0x3b   :  { %663 = vmatpush.bf16.msrb.mxu1 %v1049_v9 }
  0x3c   :  { %676 = vmatpush.bf16.msrb.mxu2 %v1057_v10 }
  0x3d   :  { %689 = vmatpush.bf16.msrb.mxu3 %v1065_v11 }
  0x3e   :  { %651 = vmatpush.bf16.msrb.mxu0 %v1040_v12 }
  0x3f   :  { %664 = vmatpush.bf16.msrb.mxu1 %v1048_v13 }
  0x40   :  { %677 = vmatpush.bf16.msrb.mxu2 %v1056_v14 }
  0x41   :  { %690 = vmatpush.bf16.msrb.mxu3 %v1064_v15  ;;  %652 = vmatmul.bf16.vlgmr.msrb.gmra.mxu0 %v72_v20 }
  0x42   :  { %665 = vmatmul.bf16.vlgmr.msrb.gmra.mxu1 %v73_v21 }
  0x43   :  { %678 = vmatmul.bf16.vlgmr.msrb.gmra.mxu2 %v74_v22 }
  0x44   :  { %691 = vmatmul.bf16.vlgmr.msrb.gmra.mxu3 %v75_v23 }
  0x9e   :  { %v601_v24 = vpop.f32.mrf.mxu0 }
  0x9f   :  { %v614_v25 = vpop.f32.mrf.mxu1  ;;  %v602_v33 = vadd.f32 %v1072_v30, %v601_v24 }
  0xa1   :  { %v615_v34 = vadd.f32 %v614_v25, %v602_v33 }
  0xa6   :  { %v627_v26 = vpop.f32.mrf.mxu2  ;;  %v603_v28 = vpop.f32.mrf.mxu0 }
  0xa7   :  { %v640_v27 = vpop.f32.mrf.mxu3  ;;  %v616_v29 = vpop.f32.mrf.mxu1  ;;  %v628_v35 = vadd.f32 %v627_v26, %v615_v34 }
  0xa9   :  { %v641_v36 = vadd.f32 %v640_v27, %v628_v35 }
  0xae   :  { %v629_v31 = vpop.f32.mrf.mxu2 }
  0xaf   :  { %v642_v32 = vpop.f32.mrf.mxu3 }
  0xbe   :  { %v653_v37 = vpop.f32.mrf.mxu0 }
  0xbf   :  { %v666_v38 = vpop.f32.mrf.mxu1  ;;  %v654_v39 = vadd.f32 %v653_v37, %v641_v36 }
  0xc1   :  { %v667_v40 = vadd.f32 %v666_v38, %v654_v39 }
  0xc6   :  { %v679_v41 = vpop.f32.mrf.mxu2  ;;  %v655_v44 = vpop.f32.mrf.mxu0 }
  0xc7   :  { %v692_v42 = vpop.f32.mrf.mxu3  ;;  %v680_v43 = vadd.f32 %v679_v41, %v667_v40  ;;  %v668_v45 = vpop.f32.mrf.mxu1 }
  0xc9   :  { %v693_v46 = vadd.f32 %v692_v42, %v680_v43 }
  0xcb   :  { %v696_v48 = vmax.f32 %v693_v46, 0.0 }
  0xcd   :  { %v701_v49 = vmul.f32 %v1073_v47, %v696_v48 }
  0xce   :  { %v681_v50 = vpop.f32.mrf.mxu2 }
  0xcf   :  { %v694_v51 = vpop.f32.mrf.mxu3  ;;  %v703_v52 = vsel %vm702_vm0, %v701_v49, 0.0 }
  0xd0   :  { %704 = vadd.xlane.f32.xlu0 %v703_v52 }
 0x143   :  { %v705_v54 = vpop.xlane.xlu0 %704 }
 0x144   :  { %v708_v55 = vadd.f32 %v707_v53, %v705_v54 }
 0x146   :  { %710 = vst.msk [vmem:[#allocation3] sm:$0xff] %vm709_vm1, %v708_v55 }
 0x14d   :  { %v729_v56 = vld [vmem:[#allocation3] sm:$0x3] }
 0x14e   :  { %730 = vst [vmem:[%s1337_s5] sm:$0x3] %v729_v56 }

</bundles_post_ra>
